<compile_context>
chip_gen: v6e
topology: v6e:2x2x1
jax: 0.10.0
libtpu: 0.0.40
codegen_flags: <defaults>
</compile_context>

<pallas_src>
import functools

import jax
import jax.numpy as jnp
from jax.experimental import pallas as pl
from jax.experimental.pallas import tpu as pltpu

EPS = 1e-5                              # nn.BatchNorm2d default eps
_BLOCK_BYTE_BUDGET = 2 * 1024 * 1024    # ~2 MiB x block -> <=8 MiB dbl-buffered in+out
_MAX_LANE_TILE = 8192                   # keeps pass-1 chunk unroll <= 64
_VMEM_LIMIT = 32 * 1024 * 1024          # safe on v5e/v6e (128 MiB) and v7x (64 MiB)


def _largest_divisor_multiple(dim, unit, cap):
    """Largest multiple of `unit` that divides `dim` and is <= cap (or None)."""
    cap = min(cap, dim)
    k = cap - cap % unit
    while k >= unit:
        if dim % k == 0:
            return k
        k -= unit
    return None


def _choose_tiles(c, hw_pad, itemsize):
    """Pick (ct, mt): (8,128)-legal tiles close to the byte budget."""
    sub = max(8, 32 // itemsize)          # dtype-aware sublane packing unit
    min_ct = min(sub, c)
    mt_cap = min(_MAX_LANE_TILE,
                 max(128, _BLOCK_BYTE_BUDGET // max(1, min_ct * itemsize)))
    mt = _largest_divisor_multiple(hw_pad, 128, mt_cap)   # hw_pad % 128 == 0
    ct_cap = max(1, _BLOCK_BYTE_BUDGET // (mt * itemsize))
    if c >= 2 * sub:
        ct_cap = min(ct_cap, c // 2)      # keep cg >= 2 for v7x megacore
    ct = _largest_divisor_multiple(c, sub, ct_cap)
    if ct is None:
        # Awkward C (no sublane-multiple divisor): use the full channel dim
        # (exempt from the (8,128) rule) and shrink mt if the block gets big.
        ct = c
        while ct * mt * itemsize > 2 * _BLOCK_BYTE_BUDGET and mt > 128:
            smaller = _largest_divisor_multiple(hw_pad, 128, mt - 128)
            if smaller is None:
                break
            mt = smaller
    return ct, mt


def _bn_stats_kernel(x_ref, psum_ref, psq_ref, sum_acc, sq_acc):
    # x_ref: (ct, mt); psum/psq: (ct, 1) partial outputs per (n, channel-tile);
    # sum_acc/sq_acc: (ct, 128) f32 lane-wide accumulators -> VALU-only hot loop.
    mi = pl.program_id(2)

    @pl.when(mi == 0)
    def _():
        sum_acc[...] = jnp.zeros_like(sum_acc)
        sq_acc[...] = jnp.zeros_like(sq_acc)

    ct, mt = x_ref.shape
    for k in range(mt // 128):            # static, lane-tile-aligned slices
        xk = x_ref[:, k * 128:(k + 1) * 128].astype(jnp.float32)
        sum_acc[...] += xk
        sq_acc[...] += xk * xk

    @pl.when(mi == pl.num_programs(2) - 1)
    def _():
        # Single cross-lane (XLU) reduction per (channel-tile, n) sweep.
        psum_ref[...] = jnp.sum(sum_acc[...], axis=-1, keepdims=True)
        psq_ref[...] = jnp.sum(sq_acc[...], axis=-1, keepdims=True)


def _bn_apply_kernel(x_ref, scale_ref, bias_ref, o_ref):
    # One FMA per element; scale/bias arrive in the compute dtype (f32, or
    # bf16 for bf16 inputs so the FMA stays on the bf16 VALU of v6e/v7x).
    o_ref[...] = (x_ref[...] * scale_ref[...] + bias_ref[...]).astype(o_ref.dtype)


@functools.partial(jax.jit, static_argnames=("eps",))
def batchnorm2d(x_nchw, gamma, beta, eps=EPS):
    """BatchNorm2d forward using batch statistics (training mode).

    x_nchw : (N, C, H, W)
    gamma  : (C,)  scale (nn.BatchNorm2d.weight, default ones)
    beta   : (C,)  shift (nn.BatchNorm2d.bias, default zeros)
    """
    n, c, h, w = x_nchw.shape
    hw = h * w
    hw_pad = ((hw + 127) // 128) * 128
    x3 = x_nchw.reshape(n, c, hw)                 # free reshape, no transpose
    if hw_pad != hw:
        # Lane-dense blocks everywhere; zero pad does not perturb sum/sumsq.
        x3 = jnp.pad(x3, ((0, 0), (0, 0), (0, hw_pad - hw)))
    # TODO(synk): for tiny H*W, additionally folding N into the block would
    # keep >= ~1 MiB per grid step; not needed at these shapes.

    itemsize = x_nchw.dtype.itemsize
    ct, mt = _choose_tiles(c, hw_pad, itemsize)
    cg = c // ct
    mg = hw_pad // mt
    nbytes = n * c * hw_pad * itemsize

    x_spec = pl.BlockSpec((None, ct, mt), lambda ci, ni, mi: (ni, ci, mi))
    part_spec = pl.BlockSpec((None, ct, 1), lambda ci, ni, mi: (ni, ci, 0))
    ch_spec = pl.BlockSpec((ct, 1), lambda ci, ni, mi: (ci, 0))

    # ---- Pass 1: per-(n, channel) partial sums / sums-of-squares. ----------
    psum, psq = pl.pallas_call(
        _bn_stats_kernel,
        out_shape=(jax.ShapeDtypeStruct((n, c, 1), jnp.float32),
                   jax.ShapeDtypeStruct((n, c, 1), jnp.float32)),
        grid=(cg, n, mg),
        in_specs=[x_spec],
        out_specs=(part_spec, part_spec),
        scratch_shapes=[pltpu.VMEM((ct, 128), jnp.float32),
                        pltpu.VMEM((ct, 128), jnp.float32)],
        compiler_params=pltpu.CompilerParams(
            dimension_semantics=("parallel", "parallel", "arbitrary"),
            vmem_limit_bytes=_VMEM_LIMIT),
        cost_estimate=pl.CostEstimate(
            flops=3 * n * c * hw_pad, transcendentals=0,
            bytes_accessed=nbytes + 2 * 4 * n * c),
    )(x3)

    # ---- Tiny epilogue (plain JAX): combine partials, build fused affine. ---
    m = float(n * hw)                              # true count, pad excluded
    total = jnp.sum(psum, axis=0)                  # (c, 1) f32
    total_sq = jnp.sum(psq, axis=0)                # (c, 1) f32
    mean = total / m
    # Biased (1/M) variance, matching BatchNorm2d's forward normalization.
    # NOTE: E[x^2]-E[x]^2 in f32 with lane-wide partial accumulation keeps the
    # summation chains short; extreme |mean|/std ratios would still favor a
    # true two-pass variance (one extra full read of x).
    var = jnp.maximum(total_sq / m - mean * mean, 0.0)
    inv_std = jax.lax.rsqrt(var + eps)
    scale = gamma.reshape(c, 1).astype(jnp.float32) * inv_std
    bias = beta.reshape(c, 1).astype(jnp.float32) - mean * scale

    apply_dtype = jnp.bfloat16 if x_nchw.dtype == jnp.bfloat16 else jnp.float32
    scale_a = scale.astype(apply_dtype)
    bias_a = bias.astype(apply_dtype)

    # ---- Pass 2: y = x*scale + bias, fully parallel, lane-dense stores. -----
    y3 = pl.pallas_call(
        _bn_apply_kernel,
        out_shape=jax.ShapeDtypeStruct((n, c, hw_pad), x_nchw.dtype),
        grid=(cg, n, mg),
        in_specs=[x_spec, ch_spec, ch_spec],
        out_specs=x_spec,
        compiler_params=pltpu.CompilerParams(
            dimension_semantics=("parallel", "parallel", "parallel"),
            vmem_limit_bytes=_VMEM_LIMIT),
        cost_estimate=pl.CostEstimate(
            flops=2 * n * c * hw_pad, transcendentals=0,
            bytes_accessed=2 * nbytes + 2 * 4 * c),
    )(x3, scale_a, bias_a)

    if hw_pad != hw:
        y3 = y3[:, :, :hw]
    return y3.reshape(n, c, h, w)


def _reference(x, gamma, beta, eps=EPS):
    c = x.shape[1]
    mean = jnp.mean(x, axis=(0, 2, 3), keepdims=True)
    var = jnp.mean((x - mean) ** 2, axis=(0, 2, 3), keepdims=True)
    return ((x - mean) / jnp.sqrt(var + eps) * gamma.reshape(1, c, 1, 1)
            + beta.reshape(1, c, 1, 1))


if __name__ == "__main__":
    key = jax.random.PRNGKey(0)
    k1, k2, k3, k4 = jax.random.split(key, 4)

    # Case 1: module-default parameters (weight=1, bias=0), HW multiple of 128.
    N, C, H, W = 2, 4, 16, 16
    x = jax.random.normal(k1, (N, C, H, W), dtype=jnp.float32)
    gamma = jnp.ones((C,), dtype=jnp.float32)
    beta = jnp.zeros((C,), dtype=jnp.float32)
    y = batchnorm2d(x, gamma, beta)
    jax.block_until_ready(y)
    assert jnp.max(jnp.abs(y - _reference(x, gamma, beta))) < 1e-4, \
        "mismatch vs reference (case 1)"

    # Case 2: non-trivial affine + H*W not a multiple of 128 (pad path).
    N2, C2, H2, W2 = 2, 8, 7, 7
    x2 = jax.random.normal(k2, (N2, C2, H2, W2), dtype=jnp.float32)
    gamma2 = 0.5 + jax.random.uniform(k3, (C2,), dtype=jnp.float32)
    beta2 = jax.random.normal(k4, (C2,), dtype=jnp.float32)
    y2 = batchnorm2d(x2, gamma2, beta2)
    jax.block_until_ready(y2)
    assert jnp.max(jnp.abs(y2 - _reference(x2, gamma2, beta2))) < 1e-4, \
        "mismatch vs reference (case 2)"

    print("KERNEL_OK")
</pallas_src>

<mosaic_0001>
module attributes {stable_mosaic.version = 11 : i64} {
  func.func @_bn_stats_kernel(%arg0: i32, %arg1: i32, %arg2: i32, %arg3: memref<1x4x256xf32, #tpu.memory_space<vmem>>, %arg4: memref<1x4x1xf32, #tpu.memory_space<vmem>>, %arg5: memref<1x4x1xf32, #tpu.memory_space<vmem>>, %arg6: memref<4x128xf32, #tpu.memory_space<vmem>>, %arg7: memref<4x128xf32, #tpu.memory_space<vmem>>) attributes {dimension_semantics = [#tpu.dimension_semantics<parallel>, #tpu.dimension_semantics<parallel>, #tpu.dimension_semantics<arbitrary>], iteration_bounds = array<i64: 1, 2, 1>, scalar_prefetch = 0 : i64, scratch_operands = 2 : i64, tpu.core_type = #tpu.core_type<tc>, window_params = [{transform_indices = @transform_0, window_bounds = array<i64: 1, 4, 256>}, {transform_indices = @transform_1, window_bounds = array<i64: 1, 4, 1>}, {transform_indices = @transform_2, window_bounds = array<i64: 1, 4, 1>}]} {
    %c0_i32 = arith.constant 0 : i32
    %0 = arith.cmpi eq, %arg2, %c0_i32 : i32
    %1 = arith.extui %0 : i1 to i32
    %c0_i32_0 = arith.constant 0 : i32
    %2 = arith.cmpi ne, %1, %c0_i32_0 : i32
    scf.if %2 {
      %cst = arith.constant 0.000000e+00 : f32
      %24 = vector.broadcast %cst : f32 to vector<4x128xf32>
      %c0_23 = arith.constant 0 : index
      %c0_24 = arith.constant 0 : index
      %25 = vector.load %arg6[%c0_23, %c0_24] : memref<4x128xf32, #tpu.memory_space<vmem>>, vector<4x128xf32>
      tpu.vector_store %arg6[%c0_23, %c0_24], %24 {strides = array<i32>} : memref<4x128xf32, #tpu.memory_space<vmem>>, vector<4x128xf32>,
      %cst_25 = arith.constant 0.000000e+00 : f32
      %26 = vector.broadcast %cst_25 : f32 to vector<4x128xf32>
      %c0_26 = arith.constant 0 : index
      %c0_27 = arith.constant 0 : index
      %27 = vector.load %arg7[%c0_26, %c0_27] : memref<4x128xf32, #tpu.memory_space<vmem>>, vector<4x128xf32>
      tpu.vector_store %arg7[%c0_26, %c0_27], %26 {strides = array<i32>} : memref<4x128xf32, #tpu.memory_space<vmem>>, vector<4x128xf32>,
    } else {
    }
    %c0 = arith.constant 0 : index
    %c0_1 = arith.constant 0 : index
    %c0_2 = arith.constant 0 : index
    %3 = vector.load %arg3[%c0, %c0_1, %c0_2] : memref<1x4x256xf32, #tpu.memory_space<vmem>>, vector<1x4x128xf32>
    %4 = vector.shape_cast %3 : vector<1x4x128xf32> to vector<4x128xf32>
    %c0_3 = arith.constant 0 : index
    %c0_4 = arith.constant 0 : index
    %5 = vector.load %arg6[%c0_3, %c0_4] : memref<4x128xf32, #tpu.memory_space<vmem>>, vector<4x128xf32>
    %6 = arith.addf %5, %4 : vector<4x128xf32>
    %c0_5 = arith.constant 0 : index
    %c0_6 = arith.constant 0 : index
    %7 = vector.load %arg6[%c0_5, %c0_6] : memref<4x128xf32, #tpu.memory_space<vmem>>, vector<4x128xf32>
    tpu.vector_store %arg6[%c0_5, %c0_6], %6 {strides = array<i32>} : memref<4x128xf32, #tpu.memory_space<vmem>>, vector<4x128xf32>,
    %c0_7 = arith.constant 0 : index
    %c0_8 = arith.constant 0 : index
    %8 = vector.load %arg7[%c0_7, %c0_8] : memref<4x128xf32, #tpu.memory_space<vmem>>, vector<4x128xf32>
    %9 = arith.mulf %4, %4 : vector<4x128xf32>
    %10 = arith.addf %8, %9 : vector<4x128xf32>
    %c0_9 = arith.constant 0 : index
    %c0_10 = arith.constant 0 : index
    %11 = vector.load %arg7[%c0_9, %c0_10] : memref<4x128xf32, #tpu.memory_space<vmem>>, vector<4x128xf32>
    tpu.vector_store %arg7[%c0_9, %c0_10], %10 {strides = array<i32>} : memref<4x128xf32, #tpu.memory_space<vmem>>, vector<4x128xf32>,
    %c0_11 = arith.constant 0 : index
    %c0_12 = arith.constant 0 : index
    %c128 = arith.constant 128 : index
    %12 = vector.load %arg3[%c0_11, %c0_12, %c128] : memref<1x4x256xf32, #tpu.memory_space<vmem>>, vector<1x4x128xf32>
    %13 = vector.shape_cast %12 : vector<1x4x128xf32> to vector<4x128xf32>
    %c0_13 = arith.constant 0 : index
    %c0_14 = arith.constant 0 : index
    %14 = vector.load %arg6[%c0_13, %c0_14] : memref<4x128xf32, #tpu.memory_space<vmem>>, vector<4x128xf32>
    %15 = arith.addf %14, %13 : vector<4x128xf32>
    %c0_15 = arith.constant 0 : index
    %c0_16 = arith.constant 0 : index
    %16 = vector.load %arg6[%c0_15, %c0_16] : memref<4x128xf32, #tpu.memory_space<vmem>>, vector<4x128xf32>
    tpu.vector_store %arg6[%c0_15, %c0_16], %15 {strides = array<i32>} : memref<4x128xf32, #tpu.memory_space<vmem>>, vector<4x128xf32>,
    %c0_17 = arith.constant 0 : index
    %c0_18 = arith.constant 0 : index
    %17 = vector.load %arg7[%c0_17, %c0_18] : memref<4x128xf32, #tpu.memory_space<vmem>>, vector<4x128xf32>
    %18 = arith.mulf %13, %13 : vector<4x128xf32>
    %19 = arith.addf %17, %18 : vector<4x128xf32>
    %c0_19 = arith.constant 0 : index
    %c0_20 = arith.constant 0 : index
    %20 = vector.load %arg7[%c0_19, %c0_20] : memref<4x128xf32, #tpu.memory_space<vmem>>, vector<4x128xf32>
    tpu.vector_store %arg7[%c0_19, %c0_20], %19 {strides = array<i32>} : memref<4x128xf32, #tpu.memory_space<vmem>>, vector<4x128xf32>,
    %c0_i32_21 = arith.constant 0 : i32
    %21 = arith.cmpi eq, %arg2, %c0_i32_21 : i32
    %22 = arith.extui %21 : i1 to i32
    %c0_i32_22 = arith.constant 0 : i32
    %23 = arith.cmpi ne, %22, %c0_i32_22 : i32
    scf.if %23 {
      %c0_23 = arith.constant 0 : index
      %c0_24 = arith.constant 0 : index
      %24 = vector.load %arg6[%c0_23, %c0_24] : memref<4x128xf32, #tpu.memory_space<vmem>>, vector<4x128xf32>
      %cst = arith.constant dense<0.000000e+00> : vector<4xf32>
      %25 = vector.multi_reduction <add>, %24, %cst [1] : vector<4x128xf32> to vector<4xf32>
      %26 = vector.shape_cast %25 : vector<4xf32> to vector<4x1xf32>
      %c0_25 = arith.constant 0 : index
      %c0_26 = arith.constant 0 : index
      %c0_27 = arith.constant 0 : index
      %27 = vector.load %arg4[%c0_25, %c0_26, %c0_27] : memref<1x4x1xf32, #tpu.memory_space<vmem>>, vector<1x4x1xf32>
      %28 = vector.shape_cast %27 : vector<1x4x1xf32> to vector<4x1xf32>
      %29 = vector.shape_cast %26 : vector<4x1xf32> to vector<1x4x1xf32>
      tpu.vector_store %arg4[%c0_25, %c0_26, %c0_27], %29 {strides = array<i32>} : memref<1x4x1xf32, #tpu.memory_space<vmem>>, vector<1x4x1xf32>,
      %c0_28 = arith.constant 0 : index
      %c0_29 = arith.constant 0 : index
      %30 = vector.load %arg7[%c0_28, %c0_29] : memref<4x128xf32, #tpu.memory_space<vmem>>, vector<4x128xf32>
      %cst_30 = arith.constant dense<0.000000e+00> : vector<4xf32>
      %31 = vector.multi_reduction <add>, %30, %cst_30 [1] : vector<4x128xf32> to vector<4xf32>
      %32 = vector.shape_cast %31 : vector<4xf32> to vector<4x1xf32>
      %c0_31 = arith.constant 0 : index
      %c0_32 = arith.constant 0 : index
      %c0_33 = arith.constant 0 : index
      %33 = vector.load %arg5[%c0_31, %c0_32, %c0_33] : memref<1x4x1xf32, #tpu.memory_space<vmem>>, vector<1x4x1xf32>
      %34 = vector.shape_cast %33 : vector<1x4x1xf32> to vector<4x1xf32>
      %35 = vector.shape_cast %32 : vector<4x1xf32> to vector<1x4x1xf32>
      tpu.vector_store %arg5[%c0_31, %c0_32, %c0_33], %35 {strides = array<i32>} : memref<1x4x1xf32, #tpu.memory_space<vmem>>, vector<1x4x1xf32>,
    } else {
    }
    return
  }
  func.func @transform_0(%arg0: i32, %arg1: i32, %arg2: i32) -> (i32, i32, i32) {
    %c0_i32 = arith.constant 0 : i32
    return %arg1, %arg0, %arg2 : i32, i32, i32
  }
  func.func @transform_1(%arg0: i32, %arg1: i32, %arg2: i32) -> (i32, i32, i32) {
    %c0_i32 = arith.constant 0 : i32
    %c0_i32_0 = arith.constant 0 : i32
    return %arg1, %arg0, %c0_i32 : i32, i32, i32
  }
  func.func @transform_2(%arg0: i32, %arg1: i32, %arg2: i32) -> (i32, i32, i32) {
    %c0_i32 = arith.constant 0 : i32
    %c0_i32_0 = arith.constant 0 : i32
    return %arg1, %arg0, %c0_i32 : i32, i32, i32
  }
}

module attributes {stable_mosaic.version = 11 : i64} {
  func.func @_bn_apply_kernel(%arg0: i32, %arg1: i32, %arg2: i32, %arg3: memref<1x4x256xf32, #tpu.memory_space<vmem>>, %arg4: memref<4x1xf32, #tpu.memory_space<vmem>>, %arg5: memref<4x1xf32, #tpu.memory_space<vmem>>, %arg6: memref<1x4x256xf32, #tpu.memory_space<vmem>>) attributes {dimension_semantics = [#tpu.dimension_semantics<parallel>, #tpu.dimension_semantics<parallel>, #tpu.dimension_semantics<parallel>], iteration_bounds = array<i64: 1, 2, 1>, scalar_prefetch = 0 : i64, scratch_operands = 0 : i64, tpu.core_type = #tpu.core_type<tc>, window_params = [{transform_indices = @transform_0, window_bounds = array<i64: 1, 4, 256>}, {transform_indices = @transform_1, window_bounds = array<i64: 4, 1>}, {transform_indices = @transform_2, window_bounds = array<i64: 4, 1>}, {transform_indices = @transform_3, window_bounds = array<i64: 1, 4, 256>}]} {
    %c0 = arith.constant 0 : index
    %c0_0 = arith.constant 0 : index
    %c0_1 = arith.constant 0 : index
    %0 = vector.load %arg3[%c0, %c0_0, %c0_1] : memref<1x4x256xf32, #tpu.memory_space<vmem>>, vector<1x4x256xf32>
    %1 = vector.shape_cast %0 : vector<1x4x256xf32> to vector<4x256xf32>
    %c0_2 = arith.constant 0 : index
    %c0_3 = arith.constant 0 : index
    %2 = vector.load %arg4[%c0_2, %c0_3] : memref<4x1xf32, #tpu.memory_space<vmem>>, vector<4x1xf32>
    %3 = vector.broadcast %2 : vector<4x1xf32> to vector<4x256xf32>
    %4 = arith.mulf %1, %3 : vector<4x256xf32>
    %c0_4 = arith.constant 0 : index
    %c0_5 = arith.constant 0 : index
    %5 = vector.load %arg5[%c0_4, %c0_5] : memref<4x1xf32, #tpu.memory_space<vmem>>, vector<4x1xf32>
    %6 = vector.broadcast %5 : vector<4x1xf32> to vector<4x256xf32>
    %7 = arith.addf %4, %6 : vector<4x256xf32>
    %c0_6 = arith.constant 0 : index
    %c0_7 = arith.constant 0 : index
    %c0_8 = arith.constant 0 : index
    %8 = vector.load %arg6[%c0_6, %c0_7, %c0_8] : memref<1x4x256xf32, #tpu.memory_space<vmem>>, vector<1x4x256xf32>
    %9 = vector.shape_cast %8 : vector<1x4x256xf32> to vector<4x256xf32>
    %10 = vector.shape_cast %7 : vector<4x256xf32> to vector<1x4x256xf32>
    tpu.vector_store %arg6[%c0_6, %c0_7, %c0_8], %10 {strides = array<i32>} : memref<1x4x256xf32, #tpu.memory_space<vmem>>, vector<1x4x256xf32>,
    return
  }
  func.func @transform_0(%arg0: i32, %arg1: i32, %arg2: i32) -> (i32, i32, i32) {
    %c0_i32 = arith.constant 0 : i32
    return %arg1, %arg0, %arg2 : i32, i32, i32
  }
  func.func @transform_1(%arg0: i32, %arg1: i32, %arg2: i32) -> (i32, i32) {
    %c0_i32 = arith.constant 0 : i32
    %c0_i32_0 = arith.constant 0 : i32
    return %arg0, %c0_i32 : i32, i32
  }
  func.func @transform_2(%arg0: i32, %arg1: i32, %arg2: i32) -> (i32, i32) {
    %c0_i32 = arith.constant 0 : i32
    %c0_i32_0 = arith.constant 0 : i32
    return %arg0, %c0_i32 : i32, i32
  }
  func.func @transform_3(%arg0: i32, %arg1: i32, %arg2: i32) -> (i32, i32, i32) {
    %c0_i32 = arith.constant 0 : i32
    return %arg1, %arg0, %arg2 : i32, i32, i32
  }
}

</mosaic_0001>

<bundles_post_ra>
// kernel: batchnorm2d.2
= control target key start
LH: loop header
LB: loop body
LE: loop exit
PB: predicated region body
PF: predicated region fallthrough
CT: control target
= control target key end

     0   :  { %s459_s9 = smov 0   ;;  %s461_s10 = smov 0   ;;  %s499_s0 = inlined_call_operand.vmem [shape: f32[2,4,256], index: 0, kind: input, shape index: {}]   ;;  %s500_s1 = inlined_call_operand.vmem [shape: f32[2,4,1], index: 1, kind: output, shape index: {0}]   ;;  %s501_s2 = inlined_call_operand.vmem [shape: f32[2,4,1], index: 2, kind: output, shape index: {1}]  }
   0x1   :  { %s463_s11 = smov 0  }
   0x2 LB: > { %s28_s12 = sadd.s32 1, %s437_s10  ;;  %p386_p0 = scmp.ge.s32.totalorder %s441_s11, 1  ;;  %s441_s11 = sphi %s463_s11, %s13_s11   ;;  %s437_s10 = sphi %s461_s10, %s503_s10   ;;  %s433_s9 = sphi %s459_s9, %s502_s9  }
   0x3   : > { %p30_p1 = scmp.ge.s32.totalorder %s28_s12, 2  ;;  %p151_p2 = scmp.lt.s32.totalorder %s441_s11, 3 }
   0x5   : > { %s505_s12 = smov (%p30_p1, %s28_s12), 0  ;;  %p152_p3 = pnand %p386_p0, %p151_p2 }
   0x6   : > { %p191_p4 = scmp.lt.s32.totalorder (!%p152_p3), %s433_s9, 1 }
   0x7   : > { %155 = sbr.rel (%p152_p3) target bundleno = 185 (0xb9), region = 24 }
   0xc   : > { %v443_v0 = vmov 0.0   ;;  %s507_s9 = smov (!%p191_p4, %s433_s9), 1  ;;  %vm244_vm0 = vcmask 1043456   ;;  %vm248_vm1 = vcmask 3072  }
   0xd   : > { %222 = vst [vmem:[#allocation2] sm:$0xf] %v443_v0  ;;  %223 = vst [vmem:[#allocation3] sm:$0xf] %v443_v0  ;;  %s393_s13 = sshll.u32 %s507_s9, 3  ;;  %s389_s17 = sshll.u32 %s507_s9, 2 }
   0xe   : > { %s202_s16 = scalar_lea.vmem %s499_s0, %s393_s13  ;;  %s210_s20 = scalar_lea.vmem %s500_s1, %s389_s17 }
   0xf   : > { %v224_v1 = vld [vmem:[%s202_s16] sm:$0xf]  ;;  %v232_v7 = vld [vmem:[%s202_s16 + $0x4] sm:$0xf]  ;;  %s217_s23 = scalar_lea.vmem %s501_s2, %s389_s17 }
  0x10   : > { %v229_v2 = vmul.f32 %v224_v1, %v224_v1  ;;  %v237_v8 = vmul.f32 %v232_v7, %v232_v7 }
  0x14   : > { %v225_v3 = vld [vmem:[#allocation2] sm:$0xf]  ;;  %v228_v4 = vld [vmem:[#allocation3] sm:$0xf] }
  0x15   : > { %v226_v5 = vadd.f32 %v225_v3, %v224_v1  ;;  %v230_v6 = vadd.f32 %v229_v2, %v228_v4 }
  0x17   : > { %227 = vst [vmem:[#allocation2] sm:$0xf] %v226_v5  ;;  %231 = vst [vmem:[#allocation3] sm:$0xf] %v230_v6 }
  0x1e   : > { %v233_v9 = vld [vmem:[#allocation2] sm:$0xf]  ;;  %v236_v10 = vld [vmem:[#allocation3] sm:$0xf] }
  0x1f   : > { %v234_v11 = vadd.f32 %v233_v9, %v232_v7  ;;  %v238_v12 = vadd.f32 %v237_v8, %v236_v10 }
  0x21   : > { %235 = vst [vmem:[#allocation2] sm:$0xf] %v234_v11  ;;  %239 = vst [vmem:[#allocation3] sm:$0xf] %v238_v12 }
  0x28   : > { %v243_v13 = vld [vmem:[#allocation2] sm:$0xf]  ;;  %v250_v14 = vld [vmem:[#allocation3] sm:$0xf] }
  0x29   : > { %v245_v15 = vsel %vm244_vm0, %v243_v13, 0.0  ;;  %v251_v16 = vsel %vm244_vm0, %v250_v14, 0.0 }
  0x2a   : > { %246 = vadd.xlane.f32.xlu0 %v245_v15 }
  0x2e   : > { %252 = vadd.xlane.f32.xlu0 %v251_v16 }
  0xb3   : > { %v247_v17 = vpop.xlane.xlu0 %246 }
  0xb4   : > { %249 = vst.msk [vmem:[%s210_s20] sm:$0xf] %vm248_vm1, %v247_v17 }
  0xb7   : > { %v253_v18 = vpop.xlane.xlu0 %252 }
  0xb8   : > { %254 = vst.msk [vmem:[%s217_s23] sm:$0xf] %vm248_vm1, %v253_v18 }
  0xb9 PF: > { %s13_s11 = sadd.s32 1, %s441_s11   ;;  %s502_s9 = smov %s437_s10 }
  0xba   : > { %p10_p5 = scmp.ge.s32.totalorder %s13_s11, 4   ;;  %s503_s10 = smov %s505_s12 }
  0xbc   :  { %12 = sbr.rel (!%p10_p5) target bundleno = 2 (0x2), region = 74 }

// kernel: batchnorm2d.3
= control target key start
LH: loop header
LB: loop body
LE: loop exit
PB: predicated region body
PF: predicated region fallthrough
CT: control target
= control target key end

     0   :  { %s535_s12 = smov 0   ;;  %s537_s13 = smov 0   ;;  %s574_s0 = inlined_call_operand.vmem [shape: f32[2,4,256], index: 0, kind: input, shape index: {}]   ;;  %s575_s1 = inlined_call_operand.vmem [shape: f32[4,1], index: 1, kind: input, shape index: {}]   ;;  %s576_s2 = inlined_call_operand.vmem [shape: f32[4,1], index: 2, kind: input, shape index: {}]   ;;  %s577_s3 = inlined_call_operand.vmem [shape: f32[2,4,256], index: 3, kind: output, shape index: {}]  }
   0x1   :  { %s539_s14 = smov 0  }
   0x2 LB: > { %s28_s15 = sadd.s32 1, %s507_s13  ;;  %p453_p0 = scmp.ge.s32.totalorder %s511_s14, 1  ;;  %s511_s14 = sphi %s539_s14, %s13_s14   ;;  %s507_s13 = sphi %s537_s13, %s579_s13   ;;  %s503_s12 = sphi %s535_s12, %s578_s12  }
   0x3   : > { %p30_p1 = scmp.ge.s32.totalorder %s28_s15, 2  ;;  %p191_p2 = scmp.lt.s32.totalorder %s511_s14, 3 }
   0x5   : > { %s581_s15 = smov (%p30_p1, %s28_s15), 0  ;;  %p192_p3 = pnand %p453_p0, %p191_p2 }
   0x6   : > { %p240_p4 = scmp.lt.s32.totalorder (!%p192_p3), %s503_s12, 1 }
   0x7   : > { %195 = sbr.rel (%p192_p3) target bundleno = 147 (0x93), region = 32 }
   0xc   : > { %v276_v0 = vld [vmem:[%s575_s1] sm:$0xf]  ;;  %v513_v1 = vmov 0   ;;  %v514_v3 = vmov 839922192   ;;  %v284_v5 = vlaneseq  ;;  %s583_s12 = smov (!%p240_p4, %s503_s12), 1 }
   0xd   : > { %488 = vset.pattern.permute.xlu0 %v513_v1  ;;  %v290_v2 = vld [vmem:[%s576_s2] sm:$0xf]  ;;  %v282_v4 = vunpack.c.l.s4 %v514_v3  ;;  %s460_s20 = sshll.u32 %s583_s12, 3 }
   0xe   : > { %279 = vperm.xlu0 %488, %v276_v0   ;;  %v285_v7 = vshrl.u32 %v284_v5, 7  ;;  %s251_s23 = scalar_lea.vmem %s574_s0, %s460_s20  ;;  %s273_s26 = scalar_lea.vmem %s577_s3, %s460_s20 }
   0xf   : > { %v283_v6 = vunpack.c.0.s8 %v282_v4  ;;  %v275_v11 = vld [vmem:[%s251_s23] sm:$0xff] }
  0x11   : > { %v286_v8 = vsub.s32 %v283_v6, %v285_v7 }
  0x12   : > { %293 = vperm.xlu0 %488, %v290_v2  }
  0x89   : > { %v280_v9 = vpop.permute.xlu0 %279 }
  0x8a   : > { %v287_v10 = vrot.slane %v280_v9, %v286_v8 }
  0x8c   : > { %v289_v13 = vmul.f32 %v287_v10, %v275_v11 }
  0x8d   : > { %v294_v12 = vpop.permute.xlu0 %293 }
  0x8e   : > { %v301_v14 = vrot.slane %v294_v12, %v286_v8 }
  0x90   : > { %v303_v15 = vadd.f32 %v301_v14, %v289_v13 }
  0x92   : > { %304 = vst [vmem:[%s273_s26] sm:$0xff] %v303_v15 }
  0x93 PF: > { %s13_s14 = sadd.s32 1, %s511_s14   ;;  %s578_s12 = smov %s507_s13 }
  0x94   : > { %p10_p5 = scmp.ge.s32.totalorder %s13_s14, 4   ;;  %s579_s13 = smov %s581_s15 }
  0x96   :  { %12 = sbr.rel (!%p10_p5) target bundleno = 2 (0x2), region = 68 }

</bundles_post_ra>
